<compile_context>
chip_gen: v6e
topology: v6e:2x2x1
jax: 0.10.0
libtpu: 0.0.40
codegen_flags: <defaults>
</compile_context>

<pallas_src>
import jax
import jax.numpy as jnp
from jax.experimental import pallas as pl
from jax.experimental.pallas import tpu as pltpu

LN_EPS = 1e-5  # nn.LayerNorm default


def _cdiv(a: int, b: int) -> int:
    return (a + b - 1) // b


def _round_up(a: int, b: int) -> int:
    return _cdiv(a, b) * b


def feature_projection_kernel(x_ref, w_ref, b_ref, o_ref):
    # x_ref: (tm, F_in)   w_ref: (F_in, F_out_p)   b_ref: (1, F_out_p)
    x = x_ref[...].astype(jnp.float32)
    n = x.shape[-1]
    inv_n = 1.0 / float(n)

    # One-pass LayerNorm statistics: var = E[x^2] - mean^2.
    s1 = jnp.sum(x, axis=-1, keepdims=True)
    s2 = jnp.sum(x * x, axis=-1, keepdims=True)
    mean = s1 * inv_n
    var = jnp.maximum(s2 * inv_n - mean * mean, 0.0)
    xn = (x - mean) * jax.lax.rsqrt(var + LN_EPS)

    # gamma/beta were folded into w/b in the wrapper; cast activations to the
    # weight dtype so bf16 weights take the fast MXU path, accumulate in f32.
    xn = xn.astype(w_ref.dtype)
    y = jnp.dot(xn, w_ref[...], preferred_element_type=jnp.float32)
    y = y + b_ref[...].astype(jnp.float32)

    # TODO(synk): training-mode nn.Dropout (random mask + rescale) not emitted;
    # eval-mode dropout is identity, matching inference semantics.
    o_ref[...] = y.astype(o_ref.dtype)


def feature_projection(x, gamma, beta, weight, bias, *, tm=512):
    """FeatureProjection forward.

    x:      [B, T, F_in]
    gamma:  [F_in]   LayerNorm weight
    beta:   [F_in]   LayerNorm bias
    weight: [F_in, F_out]  (transposed vs. PyTorch Linear's [out, in])
    bias:   [F_out]
    """
    B, T, F_in = x.shape
    F_out = weight.shape[1]
    rows = B * T

    # --- Fold LayerNorm affine into the projection (one-time, f32). ---------
    w_f32 = weight.astype(jnp.float32)
    w_folded = (gamma.astype(jnp.float32)[:, None] * w_f32).astype(weight.dtype)
    b_folded = (beta.astype(jnp.float32) @ w_f32
                + bias.astype(jnp.float32)).reshape(1, F_out)

    # --- Lane-dense output: pad F_out to a multiple of 128. -----------------
    F_out_p = _round_up(F_out, 128)
    if F_out_p != F_out:
        w_folded = jnp.pad(w_folded, ((0, 0), (0, F_out_p - F_out)))
        b_folded = jnp.pad(b_folded, ((0, 0), (0, F_out_p - F_out)))

    # --- Row tiling: clamp to the (8-aligned) row count, keep >=2 grid steps
    #     when possible so a 2-TC chip (v7x) can shard the parallel axis. -----
    tm = max(8, _round_up(tm, 8))
    tm_eff = min(tm, _round_up(rows, 8))
    if _cdiv(rows, tm_eff) == 1 and rows > 8:
        tm_eff = _round_up(_cdiv(rows, 2), 8)
    grid_n = _cdiv(rows, tm_eff)
    rows_p = grid_n * tm_eff

    x2 = x.reshape(rows, F_in)
    if rows_p != rows:
        x2 = jnp.pad(x2, ((0, rows_p - rows), (0, 0)))

    # TODO(synk): invariant weight/bias operands could be single-buffered
    # (pipeline_mode=pl.Buffered(1)) to halve their VMEM footprint on v7x.
    out2 = pl.pallas_call(
        feature_projection_kernel,
        out_shape=jax.ShapeDtypeStruct((rows_p, F_out_p), x.dtype),
        grid_spec=pltpu.PrefetchScalarGridSpec(
            num_scalar_prefetch=0,
            grid=(grid_n,),
            in_specs=[
                pl.BlockSpec((tm_eff, F_in), lambda i: (i, 0)),      # x tile
                pl.BlockSpec((F_in, F_out_p), lambda i: (0, 0)),     # folded W
                pl.BlockSpec((1, F_out_p), lambda i: (0, 0)),        # folded b
            ],
            out_specs=pl.BlockSpec((tm_eff, F_out_p), lambda i: (i, 0)),
        ),
        compiler_params=pltpu.CompilerParams(
            dimension_semantics=("parallel",),
            vmem_limit_bytes=48 * 1024 * 1024,
        ),
    )(x2, w_folded, b_folded)

    return out2[:rows, :F_out].reshape(B, T, F_out)


def _reference(x, gamma, beta, weight, bias):
    xf = x.astype(jnp.float32)
    mean = jnp.mean(xf, axis=-1, keepdims=True)
    var = jnp.mean((xf - mean) ** 2, axis=-1, keepdims=True)
    xn = (xf - mean) / jnp.sqrt(var + LN_EPS)
    xn = xn * gamma + beta
    return (xn @ weight.astype(jnp.float32) + bias).astype(x.dtype)


if __name__ == "__main__":
    # Small shapes consistent with forward: [batch, frame, in_feature]
    B, T, F_in, F_out = 2, 16, 32, 64

    key = jax.random.PRNGKey(0)
    kx, kg, kb, kw, kbias = jax.random.split(key, 5)

    x = jax.random.normal(kx, (B, T, F_in), dtype=jnp.float32)
    # Deterministic "trained-looking" parameters (LayerNorm affine + Linear).
    gamma = 1.0 + 0.1 * jax.random.normal(kg, (F_in,), dtype=jnp.float32)
    beta = 0.1 * jax.random.normal(kb, (F_in,), dtype=jnp.float32)
    # PyTorch Linear weight is [out, in]; store transposed [in, out] here.
    weight = jax.random.normal(kw, (F_in, F_out), dtype=jnp.float32) / jnp.sqrt(F_in)
    bias = 0.01 * jax.random.normal(kbias, (F_out,), dtype=jnp.float32)

    out = feature_projection(x, gamma, beta, weight, bias)
    jax.block_until_ready(out)

    ref = _reference(x, gamma, beta, weight, bias)
    assert out.shape == (B, T, F_out)
    assert jnp.allclose(out, ref, atol=1e-4, rtol=1e-4), "mismatch vs reference"

    print("KERNEL_OK")
</pallas_src>

<mosaic_0001>
module attributes {stable_mosaic.version = 11 : i64} {
  func.func @feature_projection_kernel(%arg0: i32, %arg1: memref<16x32xf32, #tpu.memory_space<vmem>>, %arg2: memref<32x128xf32, #tpu.memory_space<vmem>>, %arg3: memref<1x128xf32, #tpu.memory_space<vmem>>, %arg4: memref<16x128xf32, #tpu.memory_space<vmem>>) attributes {dimension_semantics = [#tpu.dimension_semantics<parallel>], iteration_bounds = array<i64: 2>, scalar_prefetch = 0 : i64, scratch_operands = 0 : i64, tpu.core_type = #tpu.core_type<tc>, window_params = [{transform_indices = @transform_0, window_bounds = array<i64: 16, 32>}, {pipeline_mode = #tpu.pipeline_mode<synchronous>, transform_indices = @transform_1, window_bounds = array<i64: 32, 128>}, {pipeline_mode = #tpu.pipeline_mode<synchronous>, transform_indices = @transform_2, window_bounds = array<i64: 1, 128>}, {transform_indices = @transform_3, window_bounds = array<i64: 16, 128>}]} {
    %c0 = arith.constant 0 : index
    %c0_0 = arith.constant 0 : index
    %0 = vector.load %arg1[%c0, %c0_0] : memref<16x32xf32, #tpu.memory_space<vmem>>, vector<16x32xf32>
    %cst = arith.constant dense<0.000000e+00> : vector<16xf32>
    %1 = vector.multi_reduction <add>, %0, %cst [1] : vector<16x32xf32> to vector<16xf32>
    %2 = vector.shape_cast %1 : vector<16xf32> to vector<16x1xf32>
    %3 = arith.mulf %0, %0 : vector<16x32xf32>
    %cst_1 = arith.constant dense<0.000000e+00> : vector<16xf32>
    %4 = vector.multi_reduction <add>, %3, %cst_1 [1] : vector<16x32xf32> to vector<16xf32>
    %5 = vector.shape_cast %4 : vector<16xf32> to vector<16x1xf32>
    %cst_2 = arith.constant 3.125000e-02 : f32
    %6 = vector.broadcast %cst_2 : f32 to vector<16x1xf32>
    %7 = arith.mulf %2, %6 : vector<16x1xf32>
    %cst_3 = arith.constant 3.125000e-02 : f32
    %8 = vector.broadcast %cst_3 : f32 to vector<16x1xf32>
    %9 = arith.mulf %5, %8 : vector<16x1xf32>
    %10 = arith.mulf %7, %7 : vector<16x1xf32>
    %11 = arith.subf %9, %10 : vector<16x1xf32>
    %cst_4 = arith.constant 0.000000e+00 : f32
    %12 = vector.broadcast %cst_4 : f32 to vector<16x1xf32>
    %13 = arith.maximumf %11, %12 : vector<16x1xf32>
    %14 = vector.broadcast %7 : vector<16x1xf32> to vector<16x32xf32>
    %15 = arith.subf %0, %14 : vector<16x32xf32>
    %cst_5 = arith.constant 9.99999974E-6 : f32
    %16 = vector.broadcast %cst_5 : f32 to vector<16x1xf32>
    %17 = arith.addf %13, %16 : vector<16x1xf32>
    %18 = math.rsqrt %17 : vector<16x1xf32>
    %19 = vector.broadcast %18 : vector<16x1xf32> to vector<16x32xf32>
    %20 = arith.mulf %15, %19 : vector<16x32xf32>
    %c0_6 = arith.constant 0 : index
    %c0_7 = arith.constant 0 : index
    %21 = vector.load %arg2[%c0_6, %c0_7] : memref<32x128xf32, #tpu.memory_space<vmem>>, vector<32x128xf32>
    %cst_8 = arith.constant dense<0.000000e+00> : vector<16x128xf32>
    %22 = tpu.matmul %20, %21, %cst_8 {dimension_numbers = #tpu.dot_dimension_numbers<[1], [0], [0], [1], [0, 0, 1, 1], [], []>} : vector<16x32xf32>, vector<32x128xf32>, vector<16x128xf32> -> vector<16x128xf32>
    %c0_9 = arith.constant 0 : index
    %c0_10 = arith.constant 0 : index
    %23 = vector.load %arg3[%c0_9, %c0_10] : memref<1x128xf32, #tpu.memory_space<vmem>>, vector<1x128xf32>
    %24 = vector.broadcast %23 : vector<1x128xf32> to vector<16x128xf32>
    %25 = arith.addf %22, %24 : vector<16x128xf32>
    %c0_11 = arith.constant 0 : index
    %c0_12 = arith.constant 0 : index
    %26 = vector.load %arg4[%c0_11, %c0_12] : memref<16x128xf32, #tpu.memory_space<vmem>>, vector<16x128xf32>
    tpu.vector_store %arg4[%c0_11, %c0_12], %25 {strides = array<i32>} : memref<16x128xf32, #tpu.memory_space<vmem>>, vector<16x128xf32>,
    return
  }
  func.func @transform_0(%arg0: i32) -> (i32, i32) {
    %c0_i32 = arith.constant 0 : i32
    %c0_i32_0 = arith.constant 0 : i32
    return %arg0, %c0_i32 : i32, i32
  }
  func.func @transform_1(%arg0: i32) -> (i32, i32) {
    %c0_i32 = arith.constant 0 : i32
    %c0_i32_0 = arith.constant 0 : i32
    %c0_i32_1 = arith.constant 0 : i32
    return %c0_i32, %c0_i32_0 : i32, i32
  }
  func.func @transform_2(%arg0: i32) -> (i32, i32) {
    %c0_i32 = arith.constant 0 : i32
    %c0_i32_0 = arith.constant 0 : i32
    %c0_i32_1 = arith.constant 0 : i32
    return %c0_i32, %c0_i32_0 : i32, i32
  }
  func.func @transform_3(%arg0: i32) -> (i32, i32) {
    %c0_i32 = arith.constant 0 : i32
    %c0_i32_0 = arith.constant 0 : i32
    return %arg0, %c0_i32 : i32, i32
  }
}

</mosaic_0001>

<bundles_post_ra>
// kernel: tpu_custom_call.1
= control target key start
LH: loop header
LB: loop body
LE: loop exit
PB: predicated region body
PF: predicated region fallthrough
CT: control target
= control target key end

     0   :  { %8 = vsyncpa [#allocation3], 0  ;;  %s882_s0 = inlined_call_operand.hbm [shape: f32[32,32], index: 0, kind: input, shape index: {}]   ;;  %s883_s1 = inlined_call_operand.hbm [shape: f32[32,128], index: 1, kind: input, shape index: {}]   ;;  %s884_s2 = inlined_call_operand.vmem [shape: f32[1,128], index: 2, kind: input, shape index: {}]   ;;  %s885_s3 = inlined_call_operand.hbm [shape: f32[32,128], index: 3, kind: output, shape index: {}]  }
   0x1   :  { %10 = vsyncpa [#allocation3 + $0x1], 0 }
   0x2   :  { %11 = vsyncpa [#allocation6], 0 }
   0x3   :  { %12 = vsyncpa [#allocation4], 0 }
   0x4   :  { %14 = vsyncpa [#allocation4 + $0x1], 0  ;;  %s686_s12 = smov 0   ;;  %s688_s13 = smov 0  }
   0x5   :  { %s690_s14 = smov 0   ;;  %s692_s15 = smov 0  }
   0x6 LB: > { %s707_s16 = sadd.s32 4294967295, %s657_s15   ;;  %s432_s17 = sadd.s32 4294967294, %s657_s15   ;;  %s657_s15 = sphi %s692_s15, %s907_s15   ;;  %s653_s14 = sphi %s690_s14, %s906_s14   ;;  %s649_s13 = sphi %s688_s13, %s905_s13   ;;  %s645_s12 = sphi %s686_s12, %s904_s12  }
   0x7   : > { %p40_p0 = scmp.ne.s32.totalorder %s649_s13, %s645_s12  ;;  %p886_p1 = scmp.eq.s32.totalorder %s707_s16, 0 }
   0x8   : > { %p112_p3 = scmp.eq.s32.totalorder %s432_s17, 1  ;;  %p433_p5 = scmp.ge.s32.totalorder %s657_s15, 1 }
   0x9   : > { %p716_p4 = por %p886_p1, %p40_p0  ;;  %p119_p7 = scmp.lt.s32.totalorder %s657_s15, 3 }
   0xa   : > { %p721_p6 = por %p112_p3, %p40_p0  ;;  %s659_s21 = smov [#allocation5]  }
   0xb   : > { %s890_s18 = scalar_select %p716_p4, 1, 0 }
   0xc   : > { %s891_s19 = scalar_select %p721_p6, 1, 0 }
   0xd   : > { %p726_p8 = pnand %p433_p5, %p119_p7  ;;  %s131_s22 = sshll.u32 %s659_s21, 4  ;;  %s132_s22 = int_to_ptr.vmem [resolvable:$true] %s131_s22 }
   0xe   : > { %s740_s24 = sadd.s32 1, %s657_s15   ;;  %s27_s25 = sadd.s32 1, %s653_s14 }
   0xf   : > { %s892_s20 = scalar_select %p726_p8, 1, 0 }
  0x10   : > { %p478_p9 = pneg %p726_p8  ;;  %s24_s26 = ssub.s32 %s657_s15, %s740_s24 }
  0x11   : > { %s546_s27 = scalar_lea.vmem %s132_s22, 512  ;;  %p554_p5 = scmp.lt.s32.totalorder %s132_s22, %s132_s22 }
  0x12   : > { %p735_p11 = pnand %p478_p9, %p886_p1  ;;  %p547_p13 = scmp.ne.s32.totalorder %s132_s22, %s546_s27 }
  0x13   : > { %p555_p7 = scmp.lt.s32.totalorder %s546_s27, %s546_s27 }
  0x14   : > { %p537_p12 = pneg %p735_p11 }
  0x15   : > { %p556_p10 = por %p555_p7, %p554_p5 }
  0x16   : > { %p549_p0 = pnand %p547_p13, %p537_p12 }
  0x18   : > { %p550_p3 = pneg %p549_p0 }
  0x1a   : > { %p557_p2 = pnand %p556_p10, %p550_p3 }
  0x1c   : > { %560 = shalt.err (!%p557_p2)
}
  0x1d   : > { %s660_s28 = smov 128   ;;  %s661_s29 = smov 8  }
  0x1e   : > { %481 = dma.hbm_to_vmem [thread:$0]  (!%p735_p11), %s883_s1, 512, %s132_s22, [#allocation6], %s660_s28, %s660_s28, %s661_s29  }
  0x1f   : > { %p25_p2 = scmp.eq.s32.totalorder %s24_s26, 0  ;;  %p34_p9 = scmp.ne.s32.totalorder %s653_s14, %s649_s13 }
  0x20   : > { %p35_p10 = scmp.eq.s32.totalorder %s657_s15, 0  ;;  %p491_p12 = scmp.lt.s32.totalorder %s657_s15, 2 }
  0x21   : > { %s760_s5 = scalar_select %p25_p2, %s653_s14, %s27_s25  }
  0x22   : > { %p36_p13 = por %p35_p10, %p34_p9  ;;  %p894_p0 = scmp.eq.s32.totalorder %s707_s16, 1 }
  0x23   : > { %s148_s7 = sand.u32 1, %s653_s14   ;;  %s451_s8 = sshll.u32 %s657_s15, 8 }
  0x24   : > { %p764_p3 = por %p894_p0, %p34_p9  ;;  %s436_s9 = sshll.u32 %s148_s7, 4 }
  0x25   : > { %s773_s17 = scalar_lea.hbm %s882_s0, %s451_s8  ;;  %s152_s21 = scalar_lea.vmem [#allocation2], %s436_s9 }
  0x26   : > { %s895_s6 = scalar_select %p764_p3, 1, 0 }
  0x27   : > { %s159_s22 = sshll.u32 %s152_s21, 4  ;;  %p775_p11 = pnand %p491_p12, %p36_p13  ;;  %s779_s22 = int_to_ptr.vmem [resolvable:$true] %s159_s22 }
  0x28   : > { %s781_s25 = scalar_lea.sflag [#allocation3], %s148_s7  ;;  %s561_s26 = scalar_lea.hbm %s773_s17, 256 }
  0x29   : > { %p562_p5 = scmp.ne.s32.totalorder %s773_s17, %s561_s26  ;;  %p563_p7 = pneg %p775_p11 }
  0x2a   : > { %s566_s4 = scalar_lea.hbm %s882_s0, 512  ;;  %p567_p10 = scmp.lt.s32.totalorder %s773_s17, %s882_s0 }
  0x2b   : > { %p564_p2 = pnand %p563_p7, %p562_p5  ;;  %p568_p12 = scmp.lt.s32.totalorder %s566_s4, %s561_s26 }
  0x2d   : > { %p565_p9 = pneg %p564_p2  ;;  %p569_p13 = por %p568_p12, %p567_p10 }
  0x2f   : > { %p570_p0 = pnand %p569_p13, %p565_p9 }
  0x31   : > { %573 = shalt.err (!%p570_p0)
}
  0x32   : > { %s574_s7 = scalar_lea.vmem %s779_s22, 256  ;;  %s662_s10 = smov [#allocation2]  }
  0x33   : > { %p575_p1 = scmp.ne.s32.totalorder %s779_s22, %s574_s7  ;;  %s579_s11 = sshll.u32 %s662_s10, 4  ;;  %s580_s11 = int_to_ptr.vmem [resolvable:$false] %s579_s11 }
  0x34   : > { %s581_s21 = scalar_lea.vmem %s580_s11, 512  ;;  %p582_p2 = scmp.lt.s32.totalorder %s779_s22, %s580_s11 }
  0x35   : > { %p577_p6 = pnand %p575_p1, %p563_p7  ;;  %p583_p3 = scmp.lt.s32.totalorder %s581_s21, %s574_s7 }
  0x37   : > { %p578_p5 = pneg %p577_p6  ;;  %p584_p4 = por %p583_p3, %p582_p2 }
  0x39   : > { %p585_p8 = pnand %p584_p4, %p578_p5 }
  0x3b   : > { %588 = shalt.err (!%p585_p8)
}
  0x3c   : > { %485 = dma.hbm_to_vmem [thread:$0]  (!%p775_p11), %s773_s17, 256, %s779_s22, %s781_s25, %s660_s28, %s660_s28, %s661_s29  }
  0x3d   : > { %p897_p1 = scmp.ne.s32.totalorder %s892_s20, 0 }
  0x3e   : > { %s808_s26 = sand.u32 (!%p897_p1), 1, %s649_s13   ;;  %p898_p4 = scmp.ne.s32.totalorder (!%p897_p1), %s890_s18, 0 }
  0x3f   : > { %171 = sbr.rel (%p897_p1) target bundleno = 453 (0x1c5), region = 32  ;;  %s440_s27 = sshll.u32 (!%p897_p1), %s808_s26, 4 }
  0x40   : > { %s174_s30 = scalar_lea.sflag (!%p897_p1), [#allocation3], %s808_s26  ;;  %s177_s23 = scalar_lea.vmem (!%p897_p1), [#allocation2], %s440_s27 }
  0x44   : > { %632 = dma.done.wait (%p898_p4), %s174_s30, 256  }
  0x45   : > { %634 = vsyncadd (%p898_p4), %s174_s30, 4294967040  ;;  %p899_p6 = scmp.eq.s32.totalorder %s707_s16, 0 }
  0x47   : > { %636 = dma.done.wait (%p899_p6), [#allocation6], 512   ;;  %p900_p8 = pmov %p899_p6 }
  0x48   : > { %vm208_vm0 = vcmask 261120   ;;  %v206_v0 = vld [vmem:[%s177_s23] sm:$0xff]  ;;  %v207_v1 = vld [vmem:[%s177_s23 + $0x8] sm:$0xff]  ;;  %s203_s28 = scalar_lea.vmem [#allocation7], %s440_s27  ;;  %s452_s17 = sshll.u32 %s707_s16, 8 }
  0x49   : > { %638 = vsyncadd (%p900_p8), [#allocation6], 4294966784  ;;  %v209_v2 = vsel %vm208_vm0, %v206_v0, 0.0  ;;  %v215_v3 = vmul.f32 %v206_v0, %v206_v0  ;;  %v216_v4 = vmul.f32 %v207_v1, %v207_v1  ;;  %v212_v6 = vsel %vm208_vm0, %v207_v1, 0.0  ;;  %v244_v8 = vld [vmem:[#allocation5 + $0x18] sm:$0xff]  ;;  %v243_v9 = vld [vmem:[#allocation5 + $0x10] sm:$0xff]  ;;  %s839_s4 = scalar_lea.hbm %s885_s3, %s452_s17 }
  0x4a   : > { %210 = vadd.xlane.f32.xlu0 %v209_v2  ;;  %459 = vmatprep.subr.mxu0 %v244_v8  ;;  %v242_v10 = vld [vmem:[#allocation5 + $0x8] sm:$0xff]  ;;  %v241_v11 = vld [vmem:[#allocation5] sm:$0xff]  ;;  %s349_s29 = sshll.u32 %s203_s28, 4  ;;  %s336_s8 = scalar_lea.sflag [#allocation4], %s808_s26  ;;  %s834_s29 = int_to_ptr.vmem [resolvable:$true] %s349_s29 }
  0x4b   : > { %v217_v5 = vsel %vm208_vm0, %v215_v3, 0.0  ;;  %v220_v7 = vsel %vm208_vm0, %v216_v4, 0.0  ;;  %460 = vmatpush3.msra.mxu0 %v244_v8  ;;  %v443_v34 = vld [vmem:[%s884_s2] ss:$0 sm:$0xff]  ;;  %s589_s9 = scalar_lea.vmem %s834_s29, 256  ;;  %p901_p11 = scmp.ne.s32.totalorder %s895_s6, 0 }
  0x4c   : > { %218 = vadd.xlane.f32.xlu1 %v217_v5  ;;  %461 = vmatprep.subr.mxu0 %v243_v9  ;;  %p590_p3 = scmp.ne.s32.totalorder %s834_s29, %s589_s9  ;;  %s663_s16 = smov [#allocation7]  }
  0x4d   : > { %462 = vmatpush3.msra.mxu0 %v243_v9  ;;  %s593_s7 = sshll.u32 %s663_s16, 4  ;;  %s594_s7 = int_to_ptr.vmem [resolvable:$false] %s593_s7 }
  0x4e   : > { %213 = vadd.xlane.f32.xlu0 %v212_v6  ;;  %463 = vmatprep.subr.mxu0 %v242_v10  ;;  %p591_p7 = pnand %p590_p3, %p901_p11  ;;  %s595_s10 = scalar_lea.vmem %s594_s7, 512 }
  0x4f   : > { %464 = vmatpush3.msra.mxu0 %v242_v10  ;;  %p596_p10 = scmp.lt.s32.totalorder %s834_s29, %s594_s7  ;;  %p597_p12 = scmp.lt.s32.totalorder %s595_s10, %s589_s9 }
  0x50   : > { %221 = vadd.xlane.f32.xlu1 %v220_v7  ;;  %465 = vmatprep.subr.mxu0 %v241_v11  ;;  %p592_p9 = pneg %p591_p7 }
  0x51   : > { %466 = vmatpush3.msra.mxu0 %v241_v11  ;;  %p598_p13 = por %p597_p12, %p596_p10 }
  0x53   : > { %p599_p0 = pnand %p598_p13, %p592_p9 }
  0xd3   : > { %v211_v12 = vpop.xlane.xlu0 %210 }
  0xd4   : > { %v223_v13 = vmul.f32 0.03125, %v211_v12 }
  0xd5   : > { %v219_v14 = vpop.xlane.xlu1 %218 }
  0xd6   : > { %v227_v15 = vmul.f32 %v223_v13, %v223_v13  ;;  %v225_v16 = vmul.f32 0.03125, %v219_v14  ;;  %v233_v28 = vsub.f32 %v206_v0, %v223_v13 }
  0xd7   : > { %v214_v17 = vpop.xlane.xlu0 %213 }
  0xd8   : > { %v229_v18 = vsub.f32 %v225_v16, %v227_v15  ;;  %v224_v19 = vmul.f32 0.03125, %v214_v17 }
  0xd9   : > { %v222_v20 = vpop.xlane.xlu1 %221 }
  0xda   : > { %v231_v21 = vmax.f32 %v229_v18, 0.0  ;;  %v228_v22 = vmul.f32 %v224_v19, %v224_v19  ;;  %v226_v23 = vmul.f32 0.03125, %v222_v20  ;;  %v234_v31 = vsub.f32 %v207_v1, %v224_v19 }
  0xdc   : > { %v235_v24 = vadd.f32 1e-05, %v231_v21  ;;  %v230_v25 = vsub.f32 %v226_v23, %v228_v22 }
  0xde   : > { %531 = vrsqrt.f32 %v235_v24  ;;  %v232_v26 = vmax.f32 %v230_v25, 0.0 }
  0xe0   : > { %v236_v27 = vadd.f32 1e-05, %v232_v26 }
  0xe2   : > { %533 = vrsqrt.f32 %v236_v27 }
  0xeb   : > { %v532_v29 = vpop.eup %531 }
  0xec   : > { %v239_v30 = vmul.f32 %v532_v29, %v233_v28 }
  0xee   : > { %467 = vmatprep.mubr.msk.f32.mxu0 %vm208_vm0, %v239_v30 }
  0xef   : > { %v534_v32 = vpop.eup %533 }
  0xf0   : > { %v240_v33 = vmul.f32 %v534_v32, %v234_v31 }
  0xf2   : > { %468 = vmatmul.mubr.msk.f32.vlgmr.msra.gmra.mxu0 %vm208_vm0, %v240_v33 }
 0x1b2   : > { %v469_v35 = vpop.f32.mrf.mxu0 }
 0x1b3   : > { %v330_v36 = vadd.f32 %v469_v35, %v443_v34 }
 0x1b4   : > { %v324_v37 = vpop.f32.mrf.mxu0 }
 0x1b5   : > { %334 = vst [vmem:[%s203_s28 + $0x8] sm:$0xff] %v330_v36  ;;  %v325_v38 = vadd.f32 %v443_v34, %v324_v37 }
 0x1b7   : > { %333 = vst [vmem:[%s203_s28] sm:$0xff] %v325_v38 }
 0x1b8   : > { %602 = shalt.err (!%p599_p0)
}
 0x1b9   : > { %s603_s11 = scalar_lea.hbm %s839_s4, 256  ;;  %s607_s30 = scalar_lea.hbm %s885_s3, 512 }
 0x1ba   : > { %p604_p5 = scmp.ne.s32.totalorder %s839_s4, %s603_s11  ;;  %p608_p4 = scmp.lt.s32.totalorder %s839_s4, %s885_s3 }
 0x1bb   : > { %p609_p6 = scmp.lt.s32.totalorder %s607_s30, %s603_s11 }
 0x1bc   : > { %p605_p2 = pnand %p604_p5, %p901_p11 }
 0x1bd   : > { %p610_p8 = por %p609_p6, %p608_p4 }
 0x1be   : > { %p606_p1 = pneg %p605_p2 }
 0x1c0   : > { %p611_p3 = pnand %p610_p8, %p606_p1 }
 0x1c2   : > { %614 = shalt.err (!%p611_p3)
}
 0x1c3   : > { %s664_s20 = smov 128   ;;  %s665_s28 = smov 8  }
 0x1c4   : > { %476 = dma.vmem_to_hbm [thread:$0]  (%p901_p11), %s834_s29, 256, %s839_s4, %s336_s8, %s664_s20, %s664_s20, %s665_s28  }
 0x1c5 PF: > { %s364_s17 = sand.u32 1, %s645_s12   ;;  %p902_p7 = scmp.ne.s32.totalorder %s891_s19, 0 }
 0x1c6   : > { %p903_p9 = scmp.ge.s32.totalorder %s657_s15, 2  ;;  %s365_s22 = scalar_lea.sflag [#allocation4], %s364_s17 }
 0x1c8   : > { %p487_p10 = pnand %p903_p9, %p902_p7 }
 0x1ca   : > { %p488_p12 = pneg %p487_p10 }
 0x1cc   : > { %640 = dma.done.wait (%p488_p12), %s365_s22, 256  }
 0x1cd   : > { %642 = vsyncadd (%p488_p12), %s365_s22, 4294967040  ;;  %p17_p13 = scmp.ge.s32.totalorder %s740_s24, 4   ;;  %s904_s12 = smov %s649_s13 }
 0x1ce   : > { %s905_s13 = smov %s653_s14  ;;  %s906_s14 = smov %s760_s5 }
 0x1cf   : > { %s907_s15 = smov %s740_s24  ;;  %19 = sbr.rel (!%p17_p13) target bundleno = 6 (0x6), region = 81 }
 0x1d4   :  { %370 = vsyncpa [#allocation3], 1 }
 0x1d5   :  { %372 = vsyncpa [#allocation3 + $0x1], 1 }
 0x1d6   :  { %373 = vsyncpa [#allocation6], 1 }
 0x1d7   :  { %374 = vsyncpa [#allocation4], 1 }
 0x1d8   :  { %376 = vsyncpa [#allocation4 + $0x1], 1 }

</bundles_post_ra>
